<compile_context>
chip_gen: v6e
topology: v6e:2x2x1
jax: 0.10.0
libtpu: 0.0.40
codegen_flags: <defaults>
</compile_context>

<pallas_src>
import jax
import jax.numpy as jnp
from jax.experimental import pallas as pl
from jax.experimental.pallas import tpu as pltpu


# ---------------------------------------------------------------------------
# Kernels
# ---------------------------------------------------------------------------
def _proj_kernel(h_ref, w_ref, o_ref):
    """One row tile of Wh = h @ W_all (f32 dot, rounded to bf16 exactly once)."""
    o_ref[...] = jnp.dot(h_ref[...], w_ref[...],
                         preferred_element_type=jnp.float32).astype(o_ref.dtype)


def _gat_agg_kernel(wh_ref, a_ref, invdeg_ref, o_ref):
    """One (row-tile i, col-tile k) step of  out = diag(inv_deg) @ A @ Wh.

    The f32 output block is resident across the k axis and used directly as the
    accumulator (no scratch).  A is stored as int8 0/1 and widened to bf16 here.
    """
    k = pl.program_id(1)

    @pl.when(k == 0)
    def _():
        o_ref[...] = jnp.zeros_like(o_ref)

    a = a_ref[...].astype(jnp.float32).astype(jnp.bfloat16)   # cheap VPU, hidden by DMA
    o_ref[...] += jnp.dot(a, wh_ref[...], preferred_element_type=jnp.float32)

    @pl.when(k == pl.num_programs(1) - 1)
    def _():
        # Constant-attention softmax == uniform 1/deg weighting per row.
        o_ref[...] = invdeg_ref[...] * o_ref[...]


# ---------------------------------------------------------------------------
# Wrapper
# ---------------------------------------------------------------------------
def _round_up(x, m):
    return ((x + m - 1) // m) * m


def _pick_tiles(n_node, d_out_pad):
    """Decoupled M (output-row) / K (A-column) tiles, VMEM-guarded for v7x (64 MiB)."""
    tile_k = 512
    tile_m = 2048 if n_node >= 4096 else (1024 if n_node >= 1024 else 512)

    def vmem_est(tm):
        return (2 * (tm * tile_k                 # int8 A tile, double-buffered
                     + tile_k * d_out_pad * 2    # bf16 Wh tile, double-buffered
                     + tm * 4)                   # f32 inv_deg tile
                + 2 * tm * d_out_pad * 4)        # f32 resident output block (x2 bufs)

    while tile_m > 512 and vmem_est(tile_m) > (40 << 20):
        tile_m //= 2
    return tile_m, tile_k, vmem_est(tile_m)


def const_multihead_gat(h, edge_idx, W, aggregate="concat", att_dp_rate=0.0):
    """Pallas implementation of ConstMultiHeadGATLayer.forward (eval mode)."""
    n_node, d_input = h.shape
    n_heads, _, d_output = W.shape

    # TODO(synk): training-mode attention dropout (F.dropout on the sparse att values)
    # is not implemented; eval-mode semantics (identity) are used.

    # ---- head-fused weights (concat layout directly; mean collapses to one head) ----
    if aggregate == "concat":
        W_eff = jnp.transpose(W, (1, 0, 2)).reshape(d_input, n_heads * d_output)
    else:
        W_eff = jnp.mean(W, axis=0)
    d_out_eff = W_eff.shape[1]
    d_out_pad = _round_up(d_out_eff, 128)        # lane-dense output columns

    tile_m, tile_k, vmem_est = _pick_tiles(n_node, d_out_pad)
    n_pad = _round_up(n_node, tile_m)            # tile_m is a multiple of tile_k

    # ---- degrees from edge_idx, O(E): coalesce duplicate edges, then scatter-add ----
    rows = edge_idx[0].astype(jnp.int32)
    cols = edge_idx[1].astype(jnp.int32)
    order = jnp.lexsort((cols, rows))
    r_s, c_s = rows[order], cols[order]
    is_first = jnp.concatenate(
        [jnp.ones((1,), dtype=jnp.bool_),
         (r_s[1:] != r_s[:-1]) | (c_s[1:] != c_s[:-1])])
    deg = jnp.zeros((n_pad,), jnp.float32).at[r_s].add(is_first.astype(jnp.float32))
    inv_deg = jnp.where(deg > 0.0, 1.0 / jnp.maximum(deg, 1.0), 0.0).reshape(n_pad, 1)

    # ---- densified adjacency as int8 0/1 (duplicates coalesce via .set) -------------
    # TODO(synk): for very large genuinely sparse graphs a CSR/scalar-prefetch gather
    # formulation would avoid this O(n^2) densification.
    A = jnp.zeros((n_pad, n_pad), jnp.int8).at[rows, cols].set(1)

    # ---- projection Wh = h @ W_all, hoisted out of the aggregation hot loop ---------
    h_pad = jnp.zeros((n_pad, d_input), jnp.float32).at[:n_node].set(
        h.astype(jnp.float32))
    W_pad = jnp.zeros((d_input, d_out_pad), jnp.float32).at[:, :d_out_eff].set(
        W_eff.astype(jnp.float32))

    proj_tile = min(512, n_pad)
    wh = pl.pallas_call(
        _proj_kernel,
        out_shape=jax.ShapeDtypeStruct((n_pad, d_out_pad), jnp.bfloat16),
        grid_spec=pltpu.PrefetchScalarGridSpec(
            num_scalar_prefetch=0,
            grid=(n_pad // proj_tile,),
            in_specs=[
                pl.BlockSpec((proj_tile, d_input), lambda i: (i, 0)),
                pl.BlockSpec((d_input, d_out_pad), lambda i: (0, 0)),
            ],
            out_specs=pl.BlockSpec((proj_tile, d_out_pad), lambda i: (i, 0)),
        ),
        compiler_params=pltpu.CompilerParams(dimension_semantics=("parallel",)),
    )(h_pad, W_pad)

    # ---- aggregation: out = diag(inv_deg) @ A @ Wh -----------------------------------
    n_row_tiles = n_pad // tile_m
    n_col_tiles = n_pad // tile_k
    grid = (n_row_tiles, n_col_tiles)

    flops = 2 * n_pad * n_pad * d_out_pad
    bytes_accessed = (n_pad * n_pad                              # int8 A, read once
                      + 2 * n_row_tiles * n_pad * d_out_pad      # bf16 Wh per row tile
                      + 4 * n_pad                                # f32 inv_deg
                      + 4 * n_pad * d_out_pad)                   # f32 output

    vmem_limit = int(min(max(vmem_est + (8 << 20), 32 << 20), 48 << 20))

    # TODO(synk): on v7x, confirm via xprof that both TensorCores pick up the
    # "parallel" row axis; if not, add an explicit CORE_PARALLEL leading grid axis.
    out_pad = pl.pallas_call(
        _gat_agg_kernel,
        out_shape=jax.ShapeDtypeStruct((n_pad, d_out_pad), jnp.float32),
        grid_spec=pltpu.PrefetchScalarGridSpec(
            num_scalar_prefetch=0,
            grid=grid,
            in_specs=[
                pl.BlockSpec((tile_k, d_out_pad), lambda i, k: (k, 0)),   # Wh col tile
                pl.BlockSpec((tile_m, tile_k), lambda i, k: (i, k)),      # A tile (int8)
                pl.BlockSpec((tile_m, 1), lambda i, k: (i, 0)),           # inv_deg rows
            ],
            out_specs=pl.BlockSpec((tile_m, d_out_pad), lambda i, k: (i, 0)),
        ),
        compiler_params=pltpu.CompilerParams(
            dimension_semantics=("parallel", "arbitrary"),
            vmem_limit_bytes=vmem_limit),
        cost_estimate=pl.CostEstimate(
            flops=flops, transcendentals=0, bytes_accessed=bytes_accessed),
    )(wh, A, inv_deg)

    return out_pad[:n_node, :d_out_eff]


# ---------------------------------------------------------------------------
# Pure-JAX reference for correctness checking
# ---------------------------------------------------------------------------
def _reference(h, edge_idx, W, aggregate):
    n_node = h.shape[0]
    A = jnp.zeros((n_node, n_node), jnp.float32).at[edge_idx[0], edge_idx[1]].set(1.0)
    deg = A.sum(axis=1, keepdims=True)
    A_norm = jnp.where(deg > 0.0, A / jnp.maximum(deg, 1.0), 0.0)
    Wh = jnp.einsum("nd,hdo->hno", h, W)            # (n_heads, n_node, d_output)
    h_prime = jnp.einsum("rc,hco->hro", A_norm, Wh)
    if aggregate == "concat":
        return jnp.transpose(h_prime, (1, 0, 2)).reshape(n_node, -1)
    return jnp.mean(h_prime, axis=0)


if __name__ == "__main__":
    # Small synthetic problem (deterministic).
    n_node, d_input, d_output, n_heads = 64, 32, 16, 4
    n_edges = 128

    key = jax.random.PRNGKey(0)
    k_h, k_w, k_src, k_dst = jax.random.split(key, 4)

    h = jax.random.normal(k_h, (n_node, d_input), dtype=jnp.float32)
    # Deterministic stand-in for nn.Parameter(torch.empty(n_heads, d_input, d_output)).
    W = 0.1 * jax.random.normal(k_w, (n_heads, d_input, d_output), dtype=jnp.float32)
    edge_idx = jnp.stack(
        [jax.random.randint(k_src, (n_edges,), 0, n_node),
         jax.random.randint(k_dst, (n_edges,), 0, n_node)], axis=0
    ).astype(jnp.int32)  # (2, n_edges)

    out_concat = jax.block_until_ready(
        const_multihead_gat(h, edge_idx, W, aggregate="concat"))
    out_mean = jax.block_until_ready(
        const_multihead_gat(h, edge_idx, W, aggregate="mean"))

    ref_concat = _reference(h, edge_idx, W, "concat")
    ref_mean = _reference(h, edge_idx, W, "mean")

    assert out_concat.shape == (n_node, n_heads * d_output)
    assert out_mean.shape == (n_node, d_output)
    assert jnp.allclose(out_concat, ref_concat, rtol=2e-2, atol=2e-2)
    assert jnp.allclose(out_mean, ref_mean, rtol=2e-2, atol=2e-2)

    print("KERNEL_OK")
</pallas_src>

<mosaic_0001>
module attributes {stable_mosaic.version = 11 : i64} {
  func.func @_proj_kernel(%arg0: i32, %arg1: memref<512x32xf32, #tpu.memory_space<vmem>>, %arg2: memref<32x128xf32, #tpu.memory_space<vmem>>, %arg3: memref<512x128xbf16, #tpu.memory_space<vmem>>) attributes {dimension_semantics = [#tpu.dimension_semantics<parallel>], iteration_bounds = array<i64: 1>, scalar_prefetch = 0 : i64, scratch_operands = 0 : i64, tpu.core_type = #tpu.core_type<tc>, window_params = [{transform_indices = @transform_0, window_bounds = array<i64: 512, 32>}, {pipeline_mode = #tpu.pipeline_mode<synchronous>, transform_indices = @transform_1, window_bounds = array<i64: 32, 128>}, {transform_indices = @transform_2, window_bounds = array<i64: 512, 128>}]} {
    %c0 = arith.constant 0 : index
    %c0_0 = arith.constant 0 : index
    %0 = vector.load %arg1[%c0, %c0_0] : memref<512x32xf32, #tpu.memory_space<vmem>>, vector<512x32xf32>
    %c0_1 = arith.constant 0 : index
    %c0_2 = arith.constant 0 : index
    %1 = vector.load %arg2[%c0_1, %c0_2] : memref<32x128xf32, #tpu.memory_space<vmem>>, vector<32x128xf32>
    %cst = arith.constant dense<0.000000e+00> : vector<512x128xf32>
    %2 = tpu.matmul %0, %1, %cst {dimension_numbers = #tpu.dot_dimension_numbers<[1], [0], [0], [1], [0, 0, 1, 1], [], []>} : vector<512x32xf32>, vector<32x128xf32>, vector<512x128xf32> -> vector<512x128xf32>
    %3 = arith.truncf %2 : vector<512x128xf32> to vector<512x128xbf16>
    %c0_3 = arith.constant 0 : index
    %c0_4 = arith.constant 0 : index
    %4 = vector.load %arg3[%c0_3, %c0_4] : memref<512x128xbf16, #tpu.memory_space<vmem>>, vector<512x128xbf16>
    tpu.vector_store %arg3[%c0_3, %c0_4], %3 {strides = array<i32>} : memref<512x128xbf16, #tpu.memory_space<vmem>>, vector<512x128xbf16>,
    return
  }
  func.func @transform_0(%arg0: i32) -> (i32, i32) {
    %c0_i32 = arith.constant 0 : i32
    %c0_i32_0 = arith.constant 0 : i32
    return %arg0, %c0_i32 : i32, i32
  }
  func.func @transform_1(%arg0: i32) -> (i32, i32) {
    %c0_i32 = arith.constant 0 : i32
    %c0_i32_0 = arith.constant 0 : i32
    %c0_i32_1 = arith.constant 0 : i32
    return %c0_i32, %c0_i32_0 : i32, i32
  }
  func.func @transform_2(%arg0: i32) -> (i32, i32) {
    %c0_i32 = arith.constant 0 : i32
    %c0_i32_0 = arith.constant 0 : i32
    return %arg0, %c0_i32 : i32, i32
  }
}

</mosaic_0001>

<bundles_post_ra>
// kernel: tpu_custom_call.1
= control target key start
LH: loop header
LB: loop body
LE: loop exit
PB: predicated region body
PF: predicated region fallthrough
CT: control target
= control target key end

     0   :  { %vm80_vm0 = vcmask 261120   ;;  %s1871_s0 = inlined_call_operand.vmem [shape: f32[512,32], index: 0, kind: input, shape index: {}]   ;;  %s1872_s1 = inlined_call_operand.vmem [shape: f32[32,128], index: 1, kind: input, shape index: {}]   ;;  %s1873_s2 = inlined_call_operand.hbm [shape: bf16[512,128], index: 2, kind: output, shape index: {}]  }
   0x1   :  { %v79_v0 = vld [vmem:[%s1872_s1 + $0x18] sm:$0xff]  ;;  %v78_v1 = vld [vmem:[%s1872_s1 + $0x10] sm:$0xff]  ;;  %v77_v2 = vld [vmem:[%s1872_s1 + $0x8] sm:$0xff] }
   0x2   :  { %1445 = vmatprep.subr.mxu0 %v79_v0  ;;  %1549 = vmatprep.subr.mxu1 %v79_v0  ;;  %v76_v3 = vld [vmem:[%s1872_s1] sm:$0xff]  ;;  %v13_v6 = vld [vmem:[%s1871_s0 + $0x8] sm:$0xff]  ;;  %v14_v8 = vld [vmem:[%s1871_s0 + $0x10] sm:$0xff] }
   0x3   :  { %1446 = vmatpush3.msra.mxu0 %v79_v0  ;;  %1553 = vmatpush3.msra.mxu1 %v79_v0  ;;  %v12_v4 = vld [vmem:[%s1871_s0] sm:$0xff]  ;;  %v45_v7 = vld [vmem:[%s1871_s0 + $0x108] sm:$0xff]  ;;  %v46_v9 = vld [vmem:[%s1871_s0 + $0x110] sm:$0xff] }
   0x4   :  { %1447 = vmatprep.subr.mxu0 %v78_v1  ;;  %1550 = vmatprep.subr.mxu1 %v78_v1  ;;  %v44_v5 = vld [vmem:[%s1871_s0 + $0x100] sm:$0xff]  ;;  %v15_v10 = vld [vmem:[%s1871_s0 + $0x18] sm:$0xff]  ;;  %v17_v14 = vld [vmem:[%s1871_s0 + $0x28] sm:$0xff] }
   0x5   :  { %1448 = vmatpush3.msra.mxu0 %v78_v1  ;;  %1554 = vmatpush3.msra.mxu1 %v78_v1  ;;  %v47_v11 = vld [vmem:[%s1871_s0 + $0x118] sm:$0xff]  ;;  %v16_v12 = vld [vmem:[%s1871_s0 + $0x20] sm:$0xff]  ;;  %v49_v15 = vld [vmem:[%s1871_s0 + $0x128] sm:$0xff] }
   0x6   :  { %1449 = vmatprep.subr.mxu0 %v77_v2  ;;  %1551 = vmatprep.subr.mxu1 %v77_v2  ;;  %v48_v13 = vld [vmem:[%s1871_s0 + $0x120] sm:$0xff]  ;;  %v18_v16 = vld [vmem:[%s1871_s0 + $0x30] sm:$0xff]  ;;  %v19_v18 = vld [vmem:[%s1871_s0 + $0x38] sm:$0xff] }
   0x7   :  { %1450 = vmatpush3.msra.mxu0 %v77_v2  ;;  %1555 = vmatpush3.msra.mxu1 %v77_v2  ;;  %v50_v17 = vld [vmem:[%s1871_s0 + $0x130] sm:$0xff]  ;;  %v51_v19 = vld [vmem:[%s1871_s0 + $0x138] sm:$0xff]  ;;  %v20_v20 = vld [vmem:[%s1871_s0 + $0x40] sm:$0xff] }
   0x8   :  { %1451 = vmatprep.subr.mxu0 %v76_v3  ;;  %1552 = vmatprep.subr.mxu1 %v76_v3  ;;  %v52_v21 = vld [vmem:[%s1871_s0 + $0x140] sm:$0xff] }
   0x9   :  { %1452 = vmatpush3.msra.mxu0 %v76_v3  ;;  %1556 = vmatpush3.msra.mxu1 %v76_v3 }
   0xa   :  { %1453 = vmatprep.mubr.msk.f32.mxu0 %vm80_vm0, %v12_v4  ;;  %1501 = vmatprep.mubr.msk.f32.mxu1 %vm80_vm0, %v44_v5 }
   0xb   :  { %1454 = vmatmul.mubr.msk.f32.vlgmr.msra.gmra.mxu0 %vm80_vm0, %v13_v6  ;;  %1502 = vmatmul.mubr.msk.f32.vlgmr.msra.gmra.mxu1 %vm80_vm0, %v45_v7 }
   0xc   :  { %1456 = vmatprep.mubr.msk.f32.mxu0 %vm80_vm0, %v14_v8  ;;  %1504 = vmatprep.mubr.msk.f32.mxu1 %vm80_vm0, %v46_v9 }
   0xf   :  { %1457 = vmatmul.mubr.msk.f32.gmra.mxu0 %vm80_vm0, %v15_v10  ;;  %1505 = vmatmul.mubr.msk.f32.gmra.mxu1 %vm80_vm0, %v47_v11 }
  0x10   :  { %1459 = vmatprep.mubr.msk.f32.mxu0 %vm80_vm0, %v16_v12  ;;  %1507 = vmatprep.mubr.msk.f32.mxu1 %vm80_vm0, %v48_v13 }
  0x13   :  { %1460 = vmatmul.mubr.msk.f32.gmra.mxu0 %vm80_vm0, %v17_v14  ;;  %1508 = vmatmul.mubr.msk.f32.gmra.mxu1 %vm80_vm0, %v49_v15 }
  0x14   :  { %1462 = vmatprep.mubr.msk.f32.mxu0 %vm80_vm0, %v18_v16  ;;  %1510 = vmatprep.mubr.msk.f32.mxu1 %vm80_vm0, %v50_v17 }
  0x17   :  { %1463 = vmatmul.mubr.msk.f32.gmra.mxu0 %vm80_vm0, %v19_v18  ;;  %1511 = vmatmul.mubr.msk.f32.gmra.mxu1 %vm80_vm0, %v51_v19 }
  0x18   :  { %7 = vsyncpa [#allocation3], 0  ;;  %1465 = vmatprep.mubr.msk.f32.mxu0 %vm80_vm0, %v20_v20  ;;  %1513 = vmatprep.mubr.msk.f32.mxu1 %vm80_vm0, %v52_v21  ;;  %v21_v22 = vld [vmem:[%s1871_s0 + $0x48] sm:$0xff]  ;;  %v22_v24 = vld [vmem:[%s1871_s0 + $0x50] sm:$0xff] }
  0x19   :  { %v53_v23 = vld [vmem:[%s1871_s0 + $0x148] sm:$0xff]  ;;  %v54_v25 = vld [vmem:[%s1871_s0 + $0x150] sm:$0xff]  ;;  %v23_v26 = vld [vmem:[%s1871_s0 + $0x58] sm:$0xff] }
  0x1a   :  { %v55_v27 = vld [vmem:[%s1871_s0 + $0x158] sm:$0xff]  ;;  %v24_v28 = vld [vmem:[%s1871_s0 + $0x60] sm:$0xff]  ;;  %v25_v30 = vld [vmem:[%s1871_s0 + $0x68] sm:$0xff] }
  0x1b   :  { %1466 = vmatmul.mubr.msk.f32.gmra.mxu0 %vm80_vm0, %v21_v22  ;;  %1514 = vmatmul.mubr.msk.f32.gmra.mxu1 %vm80_vm0, %v53_v23  ;;  %v56_v29 = vld [vmem:[%s1871_s0 + $0x160] sm:$0xff]  ;;  %v57_v31 = vld [vmem:[%s1871_s0 + $0x168] sm:$0xff]  ;;  %v26_v32 = vld [vmem:[%s1871_s0 + $0x70] sm:$0xff] }
  0x1c   :  { %1468 = vmatprep.mubr.msk.f32.mxu0 %vm80_vm0, %v22_v24  ;;  %1516 = vmatprep.mubr.msk.f32.mxu1 %vm80_vm0, %v54_v25  ;;  %v58_v33 = vld [vmem:[%s1871_s0 + $0x170] sm:$0xff]  ;;  %v27_v34 = vld [vmem:[%s1871_s0 + $0x78] sm:$0xff]  ;;  %v28_v36 = vld [vmem:[%s1871_s0 + $0x80] sm:$0xff] }
  0x1d   :  { %v59_v35 = vld [vmem:[%s1871_s0 + $0x178] sm:$0xff]  ;;  %v60_v37 = vld [vmem:[%s1871_s0 + $0x180] sm:$0xff]  ;;  %v29_v38 = vld [vmem:[%s1871_s0 + $0x88] sm:$0xff] }
  0x1e   :  { %v61_v39 = vld [vmem:[%s1871_s0 + $0x188] sm:$0xff]  ;;  %v30_v40 = vld [vmem:[%s1871_s0 + $0x90] sm:$0xff]  ;;  %v31_v42 = vld [vmem:[%s1871_s0 + $0x98] sm:$0xff] }
  0x1f   :  { %1469 = vmatmul.mubr.msk.f32.gmra.mxu0 %vm80_vm0, %v23_v26  ;;  %1517 = vmatmul.mubr.msk.f32.gmra.mxu1 %vm80_vm0, %v55_v27  ;;  %v62_v41 = vld [vmem:[%s1871_s0 + $0x190] sm:$0xff]  ;;  %v63_v43 = vld [vmem:[%s1871_s0 + $0x198] sm:$0xff]  ;;  %v32_v44 = vld [vmem:[%s1871_s0 + $0xa0] sm:$0xff] }
  0x20   :  { %1471 = vmatprep.mubr.msk.f32.mxu0 %vm80_vm0, %v24_v28  ;;  %1519 = vmatprep.mubr.msk.f32.mxu1 %vm80_vm0, %v56_v29  ;;  %v64_v45 = vld [vmem:[%s1871_s0 + $0x1a0] sm:$0xff]  ;;  %v33_v46 = vld [vmem:[%s1871_s0 + $0xa8] sm:$0xff]  ;;  %v34_v48 = vld [vmem:[%s1871_s0 + $0xb0] sm:$0xff] }
  0x21   :  { %v65_v47 = vld [vmem:[%s1871_s0 + $0x1a8] sm:$0xff]  ;;  %v66_v49 = vld [vmem:[%s1871_s0 + $0x1b0] sm:$0xff]  ;;  %v35_v50 = vld [vmem:[%s1871_s0 + $0xb8] sm:$0xff] }
  0x22   :  { %v67_v51 = vld [vmem:[%s1871_s0 + $0x1b8] sm:$0xff]  ;;  %v36_v52 = vld [vmem:[%s1871_s0 + $0xc0] sm:$0xff]  ;;  %v37_v54 = vld [vmem:[%s1871_s0 + $0xc8] sm:$0xff] }
  0x23   :  { %1472 = vmatmul.mubr.msk.f32.gmra.mxu0 %vm80_vm0, %v25_v30  ;;  %1520 = vmatmul.mubr.msk.f32.gmra.mxu1 %vm80_vm0, %v57_v31  ;;  %v68_v53 = vld [vmem:[%s1871_s0 + $0x1c0] sm:$0xff]  ;;  %v69_v55 = vld [vmem:[%s1871_s0 + $0x1c8] sm:$0xff]  ;;  %v38_v56 = vld [vmem:[%s1871_s0 + $0xd0] sm:$0xff] }
  0x24   :  { %1474 = vmatprep.mubr.msk.f32.mxu0 %vm80_vm0, %v26_v32  ;;  %1522 = vmatprep.mubr.msk.f32.mxu1 %vm80_vm0, %v58_v33  ;;  %v70_v57 = vld [vmem:[%s1871_s0 + $0x1d0] sm:$0xff]  ;;  %v39_v58 = vld [vmem:[%s1871_s0 + $0xd8] sm:$0xff]  ;;  %v40_v60 = vld [vmem:[%s1871_s0 + $0xe0] sm:$0xff] }
  0x25   :  { %v71_v59 = vld [vmem:[%s1871_s0 + $0x1d8] sm:$0xff]  ;;  %v72_v61 = vld [vmem:[%s1871_s0 + $0x1e0] sm:$0xff]  ;;  %v41_v62 = vld [vmem:[%s1871_s0 + $0xe8] sm:$0xff] }
  0x26   :  { %v73_v63 = vld [vmem:[%s1871_s0 + $0x1e8] sm:$0xff]  ;;  %v42_v0 = vld [vmem:[%s1871_s0 + $0xf0] sm:$0xff]  ;;  %v43_v2 = vld [vmem:[%s1871_s0 + $0xf8] sm:$0xff] }
  0x27   :  { %1475 = vmatmul.mubr.msk.f32.gmra.mxu0 %vm80_vm0, %v27_v34  ;;  %1523 = vmatmul.mubr.msk.f32.gmra.mxu1 %vm80_vm0, %v59_v35  ;;  %v74_v1 = vld [vmem:[%s1871_s0 + $0x1f0] sm:$0xff]  ;;  %v75_v3 = vld [vmem:[%s1871_s0 + $0x1f8] sm:$0xff]  ;;  %s1582_s0 = smov [#allocation2]  }
  0x28   :  { %1477 = vmatprep.mubr.msk.f32.mxu0 %vm80_vm0, %v28_v36  ;;  %1525 = vmatprep.mubr.msk.f32.mxu1 %vm80_vm0, %v60_v37  ;;  %s983_s28 = sshll.u32 %s1582_s0, 4  ;;  %s984_s28 = int_to_ptr.vmem [resolvable:$true] %s983_s28 }
  0x29   :  { %s1560_s29 = scalar_lea.vmem %s984_s28, 4096  ;;  %p1565_p1 = scmp.lt.s32.totalorder %s984_s28, %s984_s28 }
  0x2a   :  { %p1561_p0 = scmp.ne.s32.totalorder %s984_s28, %s1560_s29  ;;  %p1566_p2 = scmp.lt.s32.totalorder %s1560_s29, %s1560_s29 }
  0x2b   :  { %1478 = vmatmul.mubr.msk.f32.gmra.mxu0 %vm80_vm0, %v29_v38  ;;  %1526 = vmatmul.mubr.msk.f32.gmra.mxu1 %vm80_vm0, %v61_v39 }
  0x2c   :  { %1480 = vmatprep.mubr.msk.f32.mxu0 %vm80_vm0, %v30_v40  ;;  %1528 = vmatprep.mubr.msk.f32.mxu1 %vm80_vm0, %v62_v41  ;;  %p1567_p3 = por %p1566_p2, %p1565_p1 }
  0x2e   :  { %p1568_p4 = pnand %p1567_p3, %p1561_p0 }
  0x2f   :  { %1481 = vmatmul.mubr.msk.f32.gmra.mxu0 %vm80_vm0, %v31_v42  ;;  %1529 = vmatmul.mubr.msk.f32.gmra.mxu1 %vm80_vm0, %v63_v43 }
  0x30   :  { %1483 = vmatprep.mubr.msk.f32.mxu0 %vm80_vm0, %v32_v44  ;;  %1531 = vmatprep.mubr.msk.f32.mxu1 %vm80_vm0, %v64_v45 }
  0x33   :  { %1484 = vmatmul.mubr.msk.f32.gmra.mxu0 %vm80_vm0, %v33_v46  ;;  %1532 = vmatmul.mubr.msk.f32.gmra.mxu1 %vm80_vm0, %v65_v47 }
  0x34   :  { %1486 = vmatprep.mubr.msk.f32.mxu0 %vm80_vm0, %v34_v48  ;;  %1534 = vmatprep.mubr.msk.f32.mxu1 %vm80_vm0, %v66_v49 }
  0x37   :  { %1487 = vmatmul.mubr.msk.f32.gmra.mxu0 %vm80_vm0, %v35_v50  ;;  %1535 = vmatmul.mubr.msk.f32.gmra.mxu1 %vm80_vm0, %v67_v51 }
  0x38   :  { %1489 = vmatprep.mubr.msk.f32.mxu0 %vm80_vm0, %v36_v52  ;;  %1537 = vmatprep.mubr.msk.f32.mxu1 %vm80_vm0, %v68_v53 }
  0x3b   :  { %1490 = vmatmul.mubr.msk.f32.gmra.mxu0 %vm80_vm0, %v37_v54  ;;  %1538 = vmatmul.mubr.msk.f32.gmra.mxu1 %vm80_vm0, %v69_v55 }
  0x3c   :  { %1492 = vmatprep.mubr.msk.f32.mxu0 %vm80_vm0, %v38_v56  ;;  %1540 = vmatprep.mubr.msk.f32.mxu1 %vm80_vm0, %v70_v57 }
  0x3f   :  { %1493 = vmatmul.mubr.msk.f32.gmra.mxu0 %vm80_vm0, %v39_v58  ;;  %1541 = vmatmul.mubr.msk.f32.gmra.mxu1 %vm80_vm0, %v71_v59 }
  0x40   :  { %1495 = vmatprep.mubr.msk.f32.mxu0 %vm80_vm0, %v40_v60  ;;  %1543 = vmatprep.mubr.msk.f32.mxu1 %vm80_vm0, %v72_v61 }
  0x43   :  { %1496 = vmatmul.mubr.msk.f32.gmra.mxu0 %vm80_vm0, %v41_v62  ;;  %1544 = vmatmul.mubr.msk.f32.gmra.mxu1 %vm80_vm0, %v73_v63 }
  0x44   :  { %1498 = vmatprep.mubr.msk.f32.mxu0 %vm80_vm0, %v42_v0  ;;  %1546 = vmatprep.mubr.msk.f32.mxu1 %vm80_vm0, %v74_v1 }
  0x47   :  { %1499 = vmatmul.mubr.msk.f32.gmra.mxu0 %vm80_vm0, %v43_v2  ;;  %1547 = vmatmul.mubr.msk.f32.gmra.mxu1 %vm80_vm0, %v75_v3 }
  0xcb   :  { %v1455_v4 = vpop.f32.mrf.mxu0  ;;  %v1503_v5 = vpop.f32.mrf.mxu1 }
  0xcd   :  { %v339_v6 = vpop.f32.mrf.mxu0  ;;  %v499_v7 = vpop.f32.mrf.mxu1 }
  0xce   :  { %v1189_v8 = vpack.c.bf16 %v1455_v4, %v339_v6  ;;  %v1269_v9 = vpack.c.bf16 %v1503_v5, %v499_v7 }
  0xcf   :  { %v1458_v10 = vpop.f32.mrf.mxu0  ;;  %v1506_v11 = vpop.f32.mrf.mxu1 }
  0xd0   :  { %1190 = vst [vmem:[#allocation2] sm:$0xff] %v1189_v8   ;;  %1361 = vst [vmem:[#allocation2 + $0x80] sm:$0xff] %v1269_v9  }
  0xd1   :  { %v349_v12 = vpop.f32.mrf.mxu0  ;;  %v509_v13 = vpop.f32.mrf.mxu1 }
  0xd2   :  { %v1194_v14 = vpack.c.bf16 %v1458_v10, %v349_v12  ;;  %v1274_v15 = vpack.c.bf16 %v1506_v11, %v509_v13 }
  0xd3   :  { %v1461_v16 = vpop.f32.mrf.mxu0  ;;  %v1509_v17 = vpop.f32.mrf.mxu1 }
  0xd4   :  { %1346 = vst [vmem:[#allocation2 + $0x8] sm:$0xff] %v1194_v14   ;;  %1362 = vst [vmem:[#allocation2 + $0x88] sm:$0xff] %v1274_v15  }
  0xd5   :  { %v359_v18 = vpop.f32.mrf.mxu0  ;;  %v519_v19 = vpop.f32.mrf.mxu1 }
  0xd6   :  { %v1199_v20 = vpack.c.bf16 %v1461_v16, %v359_v18  ;;  %v1279_v21 = vpack.c.bf16 %v1509_v17, %v519_v19 }
  0xd7   :  { %v1464_v22 = vpop.f32.mrf.mxu0  ;;  %v1512_v23 = vpop.f32.mrf.mxu1 }
  0xd8   :  { %1347 = vst [vmem:[#allocation2 + $0x10] sm:$0xff] %v1199_v20   ;;  %1363 = vst [vmem:[#allocation2 + $0x90] sm:$0xff] %v1279_v21  }
  0xd9   :  { %v369_v24 = vpop.f32.mrf.mxu0  ;;  %v529_v25 = vpop.f32.mrf.mxu1 }
  0xda   :  { %v1204_v26 = vpack.c.bf16 %v1464_v22, %v369_v24  ;;  %v1284_v27 = vpack.c.bf16 %v1512_v23, %v529_v25 }
  0xdb   :  { %v1467_v28 = vpop.f32.mrf.mxu0  ;;  %v1515_v29 = vpop.f32.mrf.mxu1 }
  0xdc   :  { %1348 = vst [vmem:[#allocation2 + $0x18] sm:$0xff] %v1204_v26   ;;  %1364 = vst [vmem:[#allocation2 + $0x98] sm:$0xff] %v1284_v27  }
  0xdd   :  { %v379_v30 = vpop.f32.mrf.mxu0  ;;  %v539_v31 = vpop.f32.mrf.mxu1 }
  0xde   :  { %v1209_v32 = vpack.c.bf16 %v1467_v28, %v379_v30  ;;  %v1289_v33 = vpack.c.bf16 %v1515_v29, %v539_v31 }
  0xdf   :  { %v1470_v34 = vpop.f32.mrf.mxu0  ;;  %v1518_v35 = vpop.f32.mrf.mxu1 }
  0xe0   :  { %1349 = vst [vmem:[#allocation2 + $0x20] sm:$0xff] %v1209_v32   ;;  %1365 = vst [vmem:[#allocation2 + $0xa0] sm:$0xff] %v1289_v33  }
  0xe1   :  { %v389_v36 = vpop.f32.mrf.mxu0  ;;  %v549_v37 = vpop.f32.mrf.mxu1 }
  0xe2   :  { %v1214_v38 = vpack.c.bf16 %v1470_v34, %v389_v36  ;;  %v1294_v39 = vpack.c.bf16 %v1518_v35, %v549_v37 }
  0xe3   :  { %v1473_v40 = vpop.f32.mrf.mxu0  ;;  %v1521_v41 = vpop.f32.mrf.mxu1 }
  0xe4   :  { %1350 = vst [vmem:[#allocation2 + $0x28] sm:$0xff] %v1214_v38   ;;  %1366 = vst [vmem:[#allocation2 + $0xa8] sm:$0xff] %v1294_v39  }
  0xe5   :  { %v399_v42 = vpop.f32.mrf.mxu0  ;;  %v559_v43 = vpop.f32.mrf.mxu1 }
  0xe6   :  { %v1219_v44 = vpack.c.bf16 %v1473_v40, %v399_v42  ;;  %v1299_v45 = vpack.c.bf16 %v1521_v41, %v559_v43 }
  0xe7   :  { %v1476_v46 = vpop.f32.mrf.mxu0  ;;  %v1524_v47 = vpop.f32.mrf.mxu1 }
  0xe8   :  { %1351 = vst [vmem:[#allocation2 + $0x30] sm:$0xff] %v1219_v44   ;;  %1367 = vst [vmem:[#allocation2 + $0xb0] sm:$0xff] %v1299_v45  }
  0xe9   :  { %v409_v48 = vpop.f32.mrf.mxu0  ;;  %v569_v49 = vpop.f32.mrf.mxu1 }
  0xea   :  { %v1224_v50 = vpack.c.bf16 %v1476_v46, %v409_v48  ;;  %v1304_v51 = vpack.c.bf16 %v1524_v47, %v569_v49 }
  0xeb   :  { %v1479_v52 = vpop.f32.mrf.mxu0  ;;  %v1527_v53 = vpop.f32.mrf.mxu1 }
  0xec   :  { %1352 = vst [vmem:[#allocation2 + $0x38] sm:$0xff] %v1224_v50   ;;  %1368 = vst [vmem:[#allocation2 + $0xb8] sm:$0xff] %v1304_v51  }
  0xed   :  { %v419_v54 = vpop.f32.mrf.mxu0  ;;  %v579_v55 = vpop.f32.mrf.mxu1 }
  0xee   :  { %v1229_v56 = vpack.c.bf16 %v1479_v52, %v419_v54  ;;  %v1309_v57 = vpack.c.bf16 %v1527_v53, %v579_v55 }
  0xef   :  { %v1482_v58 = vpop.f32.mrf.mxu0  ;;  %v1530_v59 = vpop.f32.mrf.mxu1 }
  0xf0   :  { %1353 = vst [vmem:[#allocation2 + $0x40] sm:$0xff] %v1229_v56   ;;  %1369 = vst [vmem:[#allocation2 + $0xc0] sm:$0xff] %v1309_v57  }
  0xf1   :  { %v429_v60 = vpop.f32.mrf.mxu0  ;;  %v589_v61 = vpop.f32.mrf.mxu1 }
  0xf2   :  { %v1234_v62 = vpack.c.bf16 %v1482_v58, %v429_v60  ;;  %v1314_v63 = vpack.c.bf16 %v1530_v59, %v589_v61 }
  0xf3   :  { %v1485_v0 = vpop.f32.mrf.mxu0  ;;  %v1533_v1 = vpop.f32.mrf.mxu1 }
  0xf4   :  { %1354 = vst [vmem:[#allocation2 + $0x48] sm:$0xff] %v1234_v62   ;;  %1370 = vst [vmem:[#allocation2 + $0xc8] sm:$0xff] %v1314_v63  }
  0xf5   :  { %v439_v2 = vpop.f32.mrf.mxu0  ;;  %v599_v3 = vpop.f32.mrf.mxu1 }
  0xf6   :  { %v1239_v4 = vpack.c.bf16 %v1485_v0, %v439_v2  ;;  %v1319_v5 = vpack.c.bf16 %v1533_v1, %v599_v3 }
  0xf7   :  { %v1488_v6 = vpop.f32.mrf.mxu0  ;;  %v1536_v7 = vpop.f32.mrf.mxu1 }
  0xf8   :  { %1355 = vst [vmem:[#allocation2 + $0x50] sm:$0xff] %v1239_v4   ;;  %1371 = vst [vmem:[#allocation2 + $0xd0] sm:$0xff] %v1319_v5  }
  0xf9   :  { %v449_v8 = vpop.f32.mrf.mxu0  ;;  %v609_v9 = vpop.f32.mrf.mxu1 }
  0xfa   :  { %v1244_v10 = vpack.c.bf16 %v1488_v6, %v449_v8  ;;  %v1324_v11 = vpack.c.bf16 %v1536_v7, %v609_v9 }
  0xfb   :  { %v1491_v12 = vpop.f32.mrf.mxu0  ;;  %v1539_v13 = vpop.f32.mrf.mxu1 }
  0xfc   :  { %1356 = vst [vmem:[#allocation2 + $0x58] sm:$0xff] %v1244_v10   ;;  %1372 = vst [vmem:[#allocation2 + $0xd8] sm:$0xff] %v1324_v11  }
  0xfd   :  { %v459_v14 = vpop.f32.mrf.mxu0  ;;  %v619_v15 = vpop.f32.mrf.mxu1 }
  0xfe   :  { %v1249_v16 = vpack.c.bf16 %v1491_v12, %v459_v14  ;;  %v1329_v17 = vpack.c.bf16 %v1539_v13, %v619_v15 }
  0xff   :  { %v1494_v18 = vpop.f32.mrf.mxu0  ;;  %v1542_v19 = vpop.f32.mrf.mxu1 }
 0x100   :  { %1357 = vst [vmem:[#allocation2 + $0x60] sm:$0xff] %v1249_v16   ;;  %1373 = vst [vmem:[#allocation2 + $0xe0] sm:$0xff] %v1329_v17  }
 0x101   :  { %v469_v20 = vpop.f32.mrf.mxu0  ;;  %v629_v21 = vpop.f32.mrf.mxu1 }
 0x102   :  { %v1254_v22 = vpack.c.bf16 %v1494_v18, %v469_v20  ;;  %v1334_v23 = vpack.c.bf16 %v1542_v19, %v629_v21 }
 0x103   :  { %v1497_v24 = vpop.f32.mrf.mxu0  ;;  %v1545_v25 = vpop.f32.mrf.mxu1 }
 0x104   :  { %1358 = vst [vmem:[#allocation2 + $0x68] sm:$0xff] %v1254_v22   ;;  %1374 = vst [vmem:[#allocation2 + $0xe8] sm:$0xff] %v1334_v23  }
 0x105   :  { %v479_v26 = vpop.f32.mrf.mxu0  ;;  %v639_v27 = vpop.f32.mrf.mxu1 }
 0x106   :  { %v1259_v28 = vpack.c.bf16 %v1497_v24, %v479_v26  ;;  %v1339_v29 = vpack.c.bf16 %v1545_v25, %v639_v27 }
 0x107   :  { %v1500_v30 = vpop.f32.mrf.mxu0  ;;  %v1548_v31 = vpop.f32.mrf.mxu1 }
 0x108   :  { %1359 = vst [vmem:[#allocation2 + $0x70] sm:$0xff] %v1259_v28   ;;  %1375 = vst [vmem:[#allocation2 + $0xf0] sm:$0xff] %v1339_v29  }
 0x109   :  { %v489_v32 = vpop.f32.mrf.mxu0  ;;  %v649_v33 = vpop.f32.mrf.mxu1 }
 0x10a   :  { %v1264_v34 = vpack.c.bf16 %v1500_v30, %v489_v32  ;;  %v1344_v35 = vpack.c.bf16 %v1548_v31, %v649_v33 }
 0x10c   :  { %1360 = vst [vmem:[#allocation2 + $0x78] sm:$0xff] %v1264_v34   ;;  %1376 = vst [vmem:[#allocation2 + $0xf8] sm:$0xff] %v1344_v35  }
 0x10d   :  { %1571 = shalt.err (!%p1568_p4)
}
 0x10e   :  { %s1583_s30 = smov 64   ;;  %s1584_s3 = smov 4  }
 0x10f   :  { %989 = dma.vmem_to_hbm [thread:$0]  %s984_s28, 4096, %s1873_s2, [#allocation3], %s1583_s30, %s1583_s30, %s1584_s3  }
 0x110   :  { %1580 = dma.done.wait [#allocation3], 4096  }
 0x111   :  { %1581 = vsyncadd [#allocation3], 4294963200 }
 0x112   :  { %993 = vsyncpa [#allocation3], 1 }

</bundles_post_ra>
